<compile_context>
chip_gen: v5e
topology: v5e:2x2
jax: 0.10.0
libtpu: 0.0.40
codegen_flags: <defaults>
</compile_context>

<pallas_src>
import jax
import jax.numpy as jnp
from jax.experimental import pallas as pl
from jax.experimental.pallas import tpu as pltpu

PACK = 16                 # batch rows packed per 128-lane vreg row
D_IN = 8
D_OUT = 8
LANES = PACK * D_IN       # 128

# Tiling policy (in packed rows, i.e. units of 16 batch rows).
_MIN_GRID_ROWS = 1024     # below this a single un-gridded block wins
_MAX_TILE_ROWS = 1024     # ~512 KiB f32 block: near the HBM-roofline knee
_MIN_TILE_ROWS = 256      # never let per-step bookkeeping dominate DMA time


def affine_kernel(x_ref, w_ref, b_ref, o_ref):
    # y = x @ W + b : one MXU push, f32 accumulation.  The astype is a no-op
    # when W is f32; when W is stored bf16 (v5e option) it moves the matmul
    # onto the cheap bf16 MXU path while keeping an f32 accumulator.
    o_ref[...] = (
        jnp.dot(x_ref[...].astype(w_ref.dtype), w_ref[...],
                preferred_element_type=jnp.float32)
        + b_ref[...]
    ).astype(o_ref.dtype)


def prepare_params(w1, b1, w2, b2, *, bf16_weights=False):
    """Fold both Linears into one affine map and build the lane-dense
    block-diagonal weight.  Call ONCE at parameter-setup time so the
    per-forward path carries no extra XLA dispatches.
    Folding is exact up to fp reassociation vs. running the two matmuls."""
    W = w1 @ w2                                            # (8, 8)
    b = b1 @ w2 + b2                                       # (8,)
    W_big = jnp.kron(jnp.eye(PACK, dtype=W.dtype), W)      # (128, 128) block-diag
    b_big = jnp.tile(b, PACK).reshape(1, LANES)            # (1, 128)
    if bf16_weights:
        # v5e: the kron inflates FLOPs 8x and f32 MXU passes are expensive;
        # bf16 weights keep the kernel HBM-bound (results drift to ~1e-3 rel).
        W_big = W_big.astype(jnp.bfloat16)
    return W_big, b_big


def _affine(x, w, b2d):
    """y = x @ w + b2d, tiled over rows when the (packed) batch is large."""
    rows, d_in = x.shape
    d_out = b2d.shape[-1]

    if rows < _MIN_GRID_ROWS:
        # Small problem: one un-gridded block resident in VMEM.  No per-step
        # pipeline bookkeeping; DMA/compute overlap isn't worth it here.
        return pl.pallas_call(
            affine_kernel,
            out_shape=jax.ShapeDtypeStruct((rows, d_out), x.dtype),
            in_specs=[
                pl.BlockSpec(memory_space=pltpu.MemorySpace.VMEM),
                pl.BlockSpec(memory_space=pltpu.MemorySpace.VMEM),
                pl.BlockSpec(memory_space=pltpu.MemorySpace.VMEM),
            ],
            out_specs=pl.BlockSpec(memory_space=pltpu.MemorySpace.VMEM),
        )(x, w, b2d)

    # Batch-tiled path.  tile_rows <= rows//4 so the grid always has >=4 steps:
    # Pallas overlaps load(i+1)/compute(i)/store(i-1), and "parallel" semantics
    # lets v7x shard row tiles across both TensorCores.  Capped at 1024 packed
    # rows (~512 KiB f32 block), near the knee of the HBM roofline.
    tile_rows = min(_MAX_TILE_ROWS, max(_MIN_TILE_ROWS, rows // 4))
    tile_rows = (tile_rows // 8) * 8          # (8,128) block-shape constraint
    grid = (pl.cdiv(rows, tile_rows),)
    # Ragged last tile (rows % tile_rows != 0): Pallas pads the OOB read (the
    # garbage rows just feed the MXU, harmless) and masks the OOB write.
    return pl.pallas_call(
        affine_kernel,
        out_shape=jax.ShapeDtypeStruct((rows, d_out), x.dtype),
        grid=grid,
        in_specs=[
            pl.BlockSpec((tile_rows, d_in), lambda i: (i, 0)),
            # Constant index_map: weight/bias are DMA'd once and stay resident
            # in VMEM across all grid steps (64 KiB + 512 B — trivial).
            pl.BlockSpec((d_in, d_out), lambda i: (0, 0)),
            pl.BlockSpec((1, d_out), lambda i: (0, 0)),
        ],
        out_specs=pl.BlockSpec((tile_rows, d_out), lambda i: (i, 0)),
        compiler_params=pltpu.CompilerParams(
            dimension_semantics=("parallel",),   # v7x megacore sharding
        ),
    )(x, w, b2d)


def mlp_forward(x, W_big, b_big):
    """Forward pass of Model: w2(w1(x)), with params pre-folded/packed by
    prepare_params().  Works for any batch size."""
    B, d_in = x.shape
    # Lane-dense packing: 16 batch rows per 128-wide row, so loads, the matmul
    # and (most importantly) stores use all 128 lanes.  Ragged batches are
    # zero-padded up to a multiple of 16 instead of falling back to a sparse
    # 8/128-lane path with masked partial stores.
    B_pad = ((B + PACK - 1) // PACK) * PACK
    if B_pad != B:
        x = jnp.pad(x, ((0, B_pad - B), (0, 0)))
    x_packed = x.reshape(B_pad // PACK, PACK * d_in)        # (B_pad/16, 128)
    y_packed = _affine(x_packed, W_big, b_big)
    y = y_packed.reshape(B_pad, D_OUT)
    return y[:B] if B_pad != B else y


def init_params(key):
    # Deterministic init mimicking nn.Linear defaults:
    # U(-1/sqrt(fan_in), 1/sqrt(fan_in)) for weights and biases.
    k1, k2, k3, k4 = jax.random.split(key, 4)
    bound1 = 1.0 / jnp.sqrt(8.0)
    bound2 = 1.0 / jnp.sqrt(16.0)
    # Stored as (in, out) — transpose of PyTorch's (out, in) layout.
    w1 = jax.random.uniform(k1, (8, 16), jnp.float32, -bound1, bound1)
    b1 = jax.random.uniform(k2, (16,), jnp.float32, -bound1, bound1)
    w2 = jax.random.uniform(k3, (16, 8), jnp.float32, -bound2, bound2)
    b2 = jax.random.uniform(k4, (8,), jnp.float32, -bound2, bound2)
    return w1, b1, w2, b2


if __name__ == "__main__":
    key = jax.random.PRNGKey(0)
    kp, k1, k2, k3 = jax.random.split(key, 4)

    w1, b1, w2, b2 = init_params(kp)

    # Fold + pack ONCE at setup time (not on the per-forward path).
    W_big, b_big = prepare_params(w1, b1, w2, b2)
    fwd = jax.jit(mlp_forward)

    def ref_fn(x):
        return (x @ w1 + b1) @ w2 + b2

    # --- tiny batch (B=2): padded onto the lane-dense single-block path -----
    x = jax.random.normal(k1, (2, 8), jnp.float32)
    out = jax.block_until_ready(fwd(x, W_big, b_big))
    assert out.shape == (2, 8)
    assert jnp.allclose(out, ref_fn(x), atol=1e-5, rtol=1e-5), "tiny-batch mismatch"

    # --- medium, non-multiple-of-16 batch: pad path, single block -----------
    x = jax.random.normal(k2, (1000, 8), jnp.float32)
    out = jax.block_until_ready(fwd(x, W_big, b_big))
    assert out.shape == (1000, 8)
    assert jnp.allclose(out, ref_fn(x), atol=1e-4, rtol=1e-4), "medium-batch mismatch"

    # --- large batch: tiled grid path (>=4 tiles, ragged last tile) ---------
    x = jax.random.normal(k3, (33000, 8), jnp.float32)
    out = jax.block_until_ready(fwd(x, W_big, b_big))
    assert out.shape == (33000, 8)
    assert jnp.allclose(out, ref_fn(x), atol=1e-4, rtol=1e-4), "large-batch mismatch"

    # --- v5e bf16-weight option (looser tolerance, gated behind a flag) -----
    W_bf, b_bf = prepare_params(w1, b1, w2, b2, bf16_weights=True)
    out_bf = jax.block_until_ready(fwd(x, W_bf, b_bf))
    assert jnp.allclose(out_bf, ref_fn(x), atol=5e-2, rtol=5e-2), "bf16 mismatch"

    print("KERNEL_OK")
</pallas_src>

<mosaic_0001>
module attributes {stable_mosaic.version = 11 : i64} {
  func.func @affine_kernel(%arg0: memref<1x128xf32, #tpu.memory_space<vmem>>, %arg1: memref<128x128xf32, #tpu.memory_space<vmem>>, %arg2: memref<1x128xf32, #tpu.memory_space<vmem>>, %arg3: memref<1x128xf32, #tpu.memory_space<vmem>>) attributes {dimension_semantics = [], scalar_prefetch = 0 : i64, scratch_operands = 0 : i64, tpu.core_type = #tpu.core_type<tc>} {
    %c0 = arith.constant 0 : index
    %c0_0 = arith.constant 0 : index
    %0 = vector.load %arg0[%c0, %c0_0] : memref<1x128xf32, #tpu.memory_space<vmem>>, vector<1x128xf32>
    %c0_1 = arith.constant 0 : index
    %c0_2 = arith.constant 0 : index
    %1 = vector.load %arg1[%c0_1, %c0_2] : memref<128x128xf32, #tpu.memory_space<vmem>>, vector<128x128xf32>
    %cst = arith.constant dense<0.000000e+00> : vector<1x128xf32>
    %2 = tpu.matmul %0, %1, %cst {dimension_numbers = #tpu.dot_dimension_numbers<[1], [0], [0], [1], [0, 0, 1, 1], [], []>} : vector<1x128xf32>, vector<128x128xf32>, vector<1x128xf32> -> vector<1x128xf32>
    %c0_3 = arith.constant 0 : index
    %c0_4 = arith.constant 0 : index
    %3 = vector.load %arg2[%c0_3, %c0_4] : memref<1x128xf32, #tpu.memory_space<vmem>>, vector<1x128xf32>
    %4 = arith.addf %2, %3 : vector<1x128xf32>
    %c0_5 = arith.constant 0 : index
    %c0_6 = arith.constant 0 : index
    %5 = vector.load %arg3[%c0_5, %c0_6] : memref<1x128xf32, #tpu.memory_space<vmem>>, vector<1x128xf32>
    tpu.vector_store %arg3[%c0_5, %c0_6], %4 {strides = array<i32>} : memref<1x128xf32, #tpu.memory_space<vmem>>, vector<1x128xf32>,
    return
  }
}

</mosaic_0001>

<bundles_post_ra>
// kernel: mlp_forward.1
= control target key start
LH: loop header
LB: loop body
LE: loop exit
PB: predicated region body
PF: predicated region fallthrough
CT: control target
= control target key end

     0   :  { %8 = vsyncpa [#allocation3], 0  ;;  %s103_s15 = smov [#allocation2]   ;;  %s104_s17 = smov 128   ;;  %s138_s0 = inlined_call_operand.vmem [shape: f32[1,128], index: 0, kind: input, shape index: {}]   ;;  %s139_s1 = inlined_call_operand.hbm [shape: f32[128,128], index: 1, kind: input, shape index: {}]   ;;  %s140_s2 = inlined_call_operand.vmem [shape: f32[1,128], index: 2, kind: input, shape index: {}]   ;;  %s141_s3 = inlined_call_operand.vmem [shape: f32[1,128], index: 3, kind: output, shape index: {}]  }
   0x1   :  { %s15_s14 = sshll.u32 %s139_s1, 4  ;;  %s17_s16 = sshll.u32 %s103_s15, 4  ;;  %s16_s14 = int_to_ptr.hbm [resolvable:$true] %s15_s14  ;;  %s18_s16 = int_to_ptr.vmem [resolvable:$true] %s17_s16 }
   0x2   :  { %s105_s18 = smov 8  }
   0x3   :  { %23 = dma.hbm_to_vmem [thread:$0]  %s16_s14, 2048, %s18_s16, [#allocation3], %s104_s17, %s104_s17, %s105_s18  }
   0x4   :  { %101 = dma.done.wait [#allocation3], 2048  }
   0x5   :  { %102 = vsyncadd [#allocation3], 4294965248  ;;  %v46_v0 = vld [vmem:[#allocation2 + $0x78] sm:$0xff]  ;;  %v45_v1 = vld [vmem:[#allocation2 + $0x70] sm:$0xff] }
   0x6   :  { %48 = vmatpush.msra.mxu0 %v46_v0  ;;  %v44_v2 = vld [vmem:[#allocation2 + $0x68] sm:$0xff]  ;;  %v43_v3 = vld [vmem:[#allocation2 + $0x60] sm:$0xff]  ;;  %v42_v4 = vld [vmem:[#allocation2 + $0x58] sm:$0xff] }
   0x7   :  { %v41_v5 = vld [vmem:[#allocation2 + $0x50] sm:$0xff]  ;;  %v40_v6 = vld [vmem:[#allocation2 + $0x48] sm:$0xff]  ;;  %v39_v7 = vld [vmem:[#allocation2 + $0x40] sm:$0xff] }
   0x8   :  { %49 = vmatpush.msra.mxu0 %v45_v1  ;;  %v38_v8 = vld [vmem:[#allocation2 + $0x38] sm:$0xff]  ;;  %v37_v9 = vld [vmem:[#allocation2 + $0x30] sm:$0xff]  ;;  %v36_v10 = vld [vmem:[#allocation2 + $0x28] sm:$0xff] }
   0x9   :  { %v35_v11 = vld [vmem:[#allocation2 + $0x20] sm:$0xff]  ;;  %v34_v12 = vld [vmem:[#allocation2 + $0x18] sm:$0xff]  ;;  %v33_v13 = vld [vmem:[#allocation2 + $0x10] sm:$0xff] }
   0xa   :  { %50 = vmatpush.msra.mxu0 %v44_v2  ;;  %v32_v14 = vld [vmem:[#allocation2 + $0x8] sm:$0xff]  ;;  %v31_v15 = vld [vmem:[#allocation2] sm:$0xff] }
   0xb   :  { %v30_v16 = vld [vmem:[%s138_s0] sm:$0x1] }
   0xc   :  { %51 = vmatpush.msra.mxu0 %v43_v3  ;;  %v47_v17 = vld [vmem:[%s140_s2] sm:$0x1] }
   0xe   :  { %52 = vmatpush.msra.mxu0 %v42_v4 }
  0x10   :  { %53 = vmatpush.msra.mxu0 %v41_v5 }
  0x12   :  { %54 = vmatpush.msra.mxu0 %v40_v6 }
  0x14   :  { %55 = vmatpush.msra.mxu0 %v39_v7 }
  0x16   :  { %56 = vmatpush.msra.mxu0 %v38_v8 }
  0x18   :  { %57 = vmatpush.msra.mxu0 %v37_v9 }
  0x1a   :  { %58 = vmatpush.msra.mxu0 %v36_v10 }
  0x1c   :  { %59 = vmatpush.msra.mxu0 %v35_v11 }
  0x1e   :  { %60 = vmatpush.msra.mxu0 %v34_v12 }
  0x20   :  { %61 = vmatpush.msra.mxu0 %v33_v13 }
  0x22   :  { %62 = vmatpush.msra.mxu0 %v32_v14 }
  0x24   :  { %63 = vmatpush.msra.mxu0 %v31_v15 }
  0x25   :  { %64 = vmatmul.f32.vlgmr.msra.gmra.mxu0 %v30_v16 }
  0xa2   :  { %v65_v18 = vpop.f32.mrf.mxu0 }
  0xa3   :  { %v66_v19 = vadd.f32 %v65_v18, %v47_v17 }
  0xa5   :  { %68 = vst [vmem:[%s141_s3] sm:$0x1] %v66_v19 }
  0xa6   :  { %73 = vsyncpa [#allocation3], 1 }

</bundles_post_ra>
